<compile_context>
chip_gen: v6e
topology: v6e:2x2x1
jax: 0.10.0
libtpu: 0.0.40
codegen_flags: <defaults>
</compile_context>

<pallas_src>
from functools import partial

import jax
import jax.numpy as jnp
from jax.experimental import pallas as pl
from jax.experimental.pallas import tpu as pltpu

LN_EPS = 1e-5          # config.layer_norm_eps (RoBERTa default)
NORM_EPS = 1e-12       # F.normalize default eps
IGNORE_INDEX = -100    # nn.CrossEntropyLoss default ignore_index
NEG_BIG = -1e9         # bias for padded vocab columns (ignored by max/logsumexp)

_SQRT_2_OVER_PI = 0.7978845608028654
_GELU_C = 0.044715

LM_VMEM_LIMIT = 48 * 1024 * 1024   # fits v7x 64 MiB physical, > v5e 16 MiB default


# ----------------------------------------------------------------------------- helpers
def _gelu(x):
    # tanh-approximation GELU.
    # TODO(synk): torch nn.GELU defaults to exact erf; tanh approx differs ~1e-3.
    return 0.5 * x * (1.0 + jnp.tanh(_SQRT_2_OVER_PI * (x + _GELU_C * x * x * x)))


def _round_up(x, m):
    return ((x + m - 1) // m) * m


def _choose_tile(total, preferred, quantum):
    """Largest tile <= preferred that divides `total` and is a multiple of
    `quantum`; falls back to the full extent (always a legal block shape).
    `total` is always pre-padded to a multiple of `quantum` by the wrappers."""
    if total <= preferred:
        return total
    t = (preferred // quantum) * quantum
    while t >= quantum:
        if total % t == 0:
            return t
        t -= quantum
    return total


# ----------------------------------------------------------------------------- kernels
def _lm_head_ce_kernel(feat_ref, wd_ref, bd_ref, g_ref, b_ref, lab_ref,
                       dec_ref, decb_ref,
                       out_ref, loss_ref,
                       y_bf, m_sc, l_sc, p_sc):
    """RobertaLMHead (dense->gelu->LN->decoder+bias) fused with MLM CE.

    Grid = (row_tiles, vocab_tiles).  y is computed once per row tile and kept
    resident in bf16 VMEM scratch; the decoder matmul streams bf16 vocab tiles;
    the cross-entropy uses online logsumexp accumulators across the vocab axis.
    Padded vocab columns carry a -1e9 decoder bias (ignored by max / logsumexp);
    padded rows carry ignore_index labels.
    """
    j = pl.program_id(1)
    nj = pl.num_programs(1)

    @pl.when(j == 0)
    def _():
        x = feat_ref[...].astype(jnp.bfloat16)                             # (TM, H)
        h = jnp.dot(x, wd_ref[...], preferred_element_type=jnp.float32)    # bf16 MXU, f32 acc
        h = h + bd_ref[...]
        g = _gelu(h)
        mu = jnp.mean(g, axis=-1, keepdims=True)
        var = jnp.mean((g - mu) * (g - mu), axis=-1, keepdims=True)        # biased, like LayerNorm
        y = (g - mu) * jax.lax.rsqrt(var + LN_EPS) * g_ref[...] + b_ref[...]
        y_bf[...] = y.astype(jnp.bfloat16)
        m_sc[...] = jnp.full_like(m_sc, -jnp.inf)
        l_sc[...] = jnp.zeros_like(l_sc)
        p_sc[...] = jnp.zeros_like(p_sc)

    # decoder: bf16 x bf16 -> f32 accumulate on the MXU
    logits = jnp.dot(y_bf[...], dec_ref[...], preferred_element_type=jnp.float32)
    logits = logits + decb_ref[...]                                        # (TM, TN) f32
    out_ref[...] = logits.astype(jnp.bfloat16)                             # bf16 writeback

    TM, TN = logits.shape
    labels = lab_ref[...]                                                  # (TM, 1) int32
    # cheaper than adding j*TN to a full (TM, TN) iota: shift the labels instead
    labels_local = labels - j * TN                                         # (TM, 1)
    col = jax.lax.broadcasted_iota(jnp.int32, (TM, TN), 1)
    p_sc[...] += jnp.sum(jnp.where(col == labels_local, logits, 0.0),
                         axis=-1, keepdims=True)

    # online logsumexp across vocab tiles
    tile_max = jnp.max(logits, axis=-1, keepdims=True)
    m_new = jnp.maximum(m_sc[...], tile_max)
    l_sc[...] = (l_sc[...] * jnp.exp(m_sc[...] - m_new) +
                 jnp.sum(jnp.exp(logits - m_new), axis=-1, keepdims=True))
    m_sc[...] = m_new

    @pl.when(j == nj - 1)
    def _():
        lse = m_sc[...] + jnp.log(l_sc[...])
        valid = labels != IGNORE_INDEX
        loss_ref[...] = jnp.where(valid, lse - p_sc[...], 0.0)


def _l2norm_kernel(x_ref, o_ref):
    """F.normalize(x, dim=-1) row-wise (x / max(||x||, eps))."""
    x = x_ref[...]
    inv = jax.lax.rsqrt(jnp.maximum(jnp.sum(x * x, axis=-1, keepdims=True),
                                    NORM_EPS * NORM_EPS))
    o_ref[...] = x * inv


def _nce_kernel(o1_ref, o2t_ref, logits_ref, loss_ref, *, moco_t, n_vec, m_rows):
    """Pre-normalized bf16 o1 (N,C) x pre-normalized/pre-transposed bf16 o2^T
    (C, nv*M): one lane-dense GEMM, static-slice max over nv, /T, CE against
    labels=arange(N)."""
    # TODO(synk): single-block grid assumes N and nv*M fit VMEM; a MoCo-style
    # queue (large M) would need N/M tiling with an online CE like the LM head.
    s = jnp.dot(o1_ref[...], o2t_ref[...],
                preferred_element_type=jnp.float32)                        # (N, nv*M)
    sim = s[:, 0:m_rows]
    for v in range(1, n_vec):                                              # static, nv is tiny
        sim = jnp.maximum(sim, s[:, v * m_rows:(v + 1) * m_rows])

    logits = sim * (1.0 / moco_t)
    logits_ref[...] = logits

    N, M = logits.shape
    mx = jnp.max(logits, axis=-1, keepdims=True)
    lse = mx + jnp.log(jnp.sum(jnp.exp(logits - mx), axis=-1, keepdims=True))
    row = jax.lax.broadcasted_iota(jnp.int32, (N, M), 0)
    col = jax.lax.broadcasted_iota(jnp.int32, (N, M), 1)
    picked = jnp.sum(jnp.where(row == col, logits, 0.0), axis=-1, keepdims=True)
    loss_ref[...] = jnp.mean(lse - picked, axis=0, keepdims=True)          # (1, 1)


# ----------------------------------------------------------------------------- wrappers
def lm_head_with_mlm_ce(feat2d, labels2d, params, tm=512, tn=2048):
    """Fused LM head + MLM cross-entropy.

    Returns (logits (R, V) bf16, mlm_loss).  Rows and vocab are padded to the
    tile grid; padded rows carry ignore_index labels, padded vocab columns a
    -1e9 bias, and the logits are sliced back to (R, V).
    """
    R, H = feat2d.shape
    Vp = params["dec_t_bf16"].shape[1]          # padded vocab (multiple of 128)
    V = params["vocab_size"]

    ROW_Q = 16                                  # bf16-friendly sublane quantum
    tm = max(ROW_Q, (min(tm, _round_up(R, ROW_Q)) // ROW_Q) * ROW_Q)
    Rp = _round_up(R, tm)
    # keep >= 2 row tiles when possible so the 'parallel' axis shards on v7x megacore
    if Rp // tm < 2 and tm > ROW_Q:
        tm = max(ROW_Q, ((tm // 2) // ROW_Q) * ROW_Q)
        Rp = _round_up(R, tm)

    tn = _choose_tile(Vp, tn, 128)
    grid = (Rp // tm, Vp // tn)

    featp = feat2d if Rp == R else jnp.pad(feat2d, ((0, Rp - R), (0, 0)))
    labelsp = labels2d if Rp == R else jnp.pad(labels2d, ((0, Rp - R), (0, 0)),
                                               constant_values=IGNORE_INDEX)

    logits_p, loss_rows = pl.pallas_call(
        _lm_head_ce_kernel,
        out_shape=(jax.ShapeDtypeStruct((Rp, Vp), jnp.bfloat16),
                   jax.ShapeDtypeStruct((Rp, 1), jnp.float32)),
        grid=grid,
        in_specs=[
            pl.BlockSpec((tm, H), lambda i, j: (i, 0)),    # features (fetched once per row tile)
            pl.BlockSpec((H, H), lambda i, j: (0, 0)),     # W_dense^T (bf16, resident)
            pl.BlockSpec((1, H), lambda i, j: (0, 0)),     # b_dense
            pl.BlockSpec((1, H), lambda i, j: (0, 0)),     # ln gamma
            pl.BlockSpec((1, H), lambda i, j: (0, 0)),     # ln beta
            pl.BlockSpec((tm, 1), lambda i, j: (i, 0)),    # labels (int32)
            pl.BlockSpec((H, tn), lambda i, j: (0, j)),    # decoder weight (bf16), streamed
            pl.BlockSpec((1, tn), lambda i, j: (0, j)),    # decoder bias (padded cols -1e9)
        ],
        out_specs=(
            pl.BlockSpec((tm, tn), lambda i, j: (i, j)),   # logits (bf16)
            pl.BlockSpec((tm, 1), lambda i, j: (i, 0)),    # per-row CE (written at last j)
        ),
        scratch_shapes=[
            pltpu.VMEM((tm, H), jnp.bfloat16),             # y (LN output), reused across vocab tiles
            pltpu.VMEM((tm, 1), jnp.float32),              # running max
            pltpu.VMEM((tm, 1), jnp.float32),              # running sum-exp
            pltpu.VMEM((tm, 1), jnp.float32),              # picked (target logit)
        ],
        compiler_params=pltpu.CompilerParams(
            dimension_semantics=("parallel", "arbitrary"),
            vmem_limit_bytes=LM_VMEM_LIMIT),
    )(featp, params["w_dense_t_bf16"], params["b_dense"],
      params["ln_gamma"], params["ln_beta"], labelsp,
      params["dec_t_bf16"], params["dec_bias"])

    total = jnp.sum(loss_rows)
    cnt = jnp.sum((labelsp != IGNORE_INDEX).astype(jnp.float32))
    # Guard the all-ignored case (0/0); return 0.0 instead of NaN.
    mlm_loss = jnp.where(cnt > 0, total / jnp.maximum(cnt, 1.0), 0.0)
    return logits_p[:R, :V], mlm_loss


def l2_normalize(x2d, tm=512):
    """Row-wise F.normalize; rows padded to the tile grid and sliced back."""
    R, C = x2d.shape
    tm_eff = min(tm, _round_up(R, 8))
    Rp = _round_up(R, tm_eff)
    xp = x2d if Rp == R else jnp.pad(x2d, ((0, Rp - R), (0, 0)))
    out = pl.pallas_call(
        _l2norm_kernel,
        out_shape=jax.ShapeDtypeStruct((Rp, C), jnp.float32),
        grid=(Rp // tm_eff,),
        in_specs=[pl.BlockSpec((tm_eff, C), lambda i: (i, 0))],
        out_specs=pl.BlockSpec((tm_eff, C), lambda i: (i, 0)),
        compiler_params=pltpu.CompilerParams(dimension_semantics=("parallel",)),
    )(xp)
    return out if Rp == R else out[:R]


def nce_head(o1n_bf, o2nT_bf, n_vec, m_rows, moco_t):
    """o1n_bf: (N, C) bf16 normalized; o2nT_bf: (C, n_vec*M) bf16 normalized,
    v-major columns.  Returns (logits, loss)."""
    N, C = o1n_bf.shape
    logits, loss = pl.pallas_call(
        partial(_nce_kernel, moco_t=float(moco_t), n_vec=n_vec, m_rows=m_rows),
        out_shape=(jax.ShapeDtypeStruct((N, m_rows), jnp.float32),
                   jax.ShapeDtypeStruct((1, 1), jnp.float32)),
        grid=(1,),
        in_specs=[pl.BlockSpec((N, C), lambda i: (0, 0)),
                  pl.BlockSpec((C, n_vec * m_rows), lambda i: (0, 0))],
        out_specs=(pl.BlockSpec((N, m_rows), lambda i: (0, 0)),
                   pl.BlockSpec((1, 1), lambda i: (0, 0))),
    )(o1n_bf, o2nT_bf)
    return logits, loss[0, 0]


# ----------------------------------------------------------------------------- model
def encoder_stub(token_ids, word_emb, pos_emb):
    # TODO(synk): full RobertaModel transformer encoder not re-implemented;
    # deterministic embedding + positional lookup stand-in (plain-JAX glue).
    S = token_ids.shape[1]
    h = word_emb[token_ids] + pos_emb[jnp.arange(S)][None, :, :]
    return jnp.tanh(h)


def init_params(key, hidden, vocab, max_pos):
    k = jax.random.split(key, 4)
    word_emb = 0.02 * jax.random.normal(k[0], (vocab, hidden), jnp.float32)
    pos_emb = 0.02 * jax.random.normal(k[1], (max_pos, hidden), jnp.float32)
    w_dense = 0.02 * jax.random.normal(k[2], (hidden, hidden), jnp.float32)   # torch [out,in]
    b_dense = 0.02 * jax.random.normal(k[3], (1, hidden), jnp.float32)

    # Tied decoder weight [H, V], padded on the vocab axis to a lane multiple so
    # the kernel never falls back to a full-extent vocab block (V=50265 case).
    pad_to = 2048 if vocab >= 2048 else 128
    vocab_p = _round_up(vocab, pad_to)
    dec_t_bf16 = jnp.zeros((hidden, vocab_p), jnp.bfloat16)
    dec_t_bf16 = dec_t_bf16.at[:, :vocab].set(word_emb.T.astype(jnp.bfloat16))
    dec_bias = jnp.full((1, vocab_p), NEG_BIG, jnp.float32)
    dec_bias = dec_bias.at[:, :vocab].set(0.0)            # real decoder bias is zeros

    return dict(
        word_emb=word_emb,
        pos_emb=pos_emb,
        w_dense_t_bf16=w_dense.T.astype(jnp.bfloat16),    # [in, out] bf16 for the MXU
        b_dense=b_dense,
        ln_gamma=jnp.ones((1, hidden), jnp.float32),
        ln_beta=jnp.zeros((1, hidden), jnp.float32),
        dec_t_bf16=dec_t_bf16,                            # padded, streamed by the kernel
        dec_bias=dec_bias,                                # padded cols = -1e9
        vocab_size=vocab,
    )


def simple_model_forward(params, inputs_m, inputs1=None, inputs2=None,
                         mlm_labels=None, n_vec=2, moco_t=0.07,
                         lm_tm=512, lm_tn=2048):
    out_m = encoder_stub(inputs_m, params["word_emb"], params["pos_emb"])    # (B,S,H)

    if inputs1 is None and inputs2 is None:
        if n_vec > 0:
            sl = out_m[:, :n_vec, :]
            B, Nv, H = sl.shape
            return l2_normalize(sl.reshape(B * Nv, H)).reshape(B, Nv, H)
        return l2_normalize(out_m[:, 0, :])

    out1 = encoder_stub(inputs1, params["word_emb"], params["pos_emb"])[:, 0, :]   # (N, H)
    out2 = encoder_stub(inputs2, params["word_emb"], params["pos_emb"])            # (M, S, H)

    B, S, H = out_m.shape
    V = params["vocab_size"]
    R = B * S

    if mlm_labels is None:
        labels2d = jnp.full((R, 1), IGNORE_INDEX, jnp.int32)
    else:
        labels2d = mlm_labels.reshape(R, 1).astype(jnp.int32)

    lm_logits2d, mlm_loss = lm_head_with_mlm_ce(out_m.reshape(R, H), labels2d,
                                                params, tm=lm_tm, tn=lm_tn)
    lm_logits = lm_logits2d.reshape(B, S, V)               # bf16 (matmul was bf16 anyway)
    if mlm_labels is None:
        mlm_loss = None

    # n_vec == 0 path ('nc,mc->nm' over outputs2[:,0,:]) is the n_eff == 1 case.
    n_eff = max(n_vec, 1)
    M = out2.shape[0]
    # normalize with the Pallas kernel, then lay out a lane-dense (C, nv*M)
    # bf16 RHS in the wrapper (layout plumbing, not compute).
    o1n = l2_normalize(out1)
    o2_slab = jnp.transpose(out2[:, :n_eff, :], (1, 0, 2)).reshape(n_eff * M, H)
    o2n = l2_normalize(o2_slab)
    o2nT_bf = jnp.transpose(o2n).astype(jnp.bfloat16)      # (H, nv*M), v-major columns
    _, nce_loss = nce_head(o1n.astype(jnp.bfloat16), o2nT_bf, n_eff, M, moco_t)

    return lm_logits, mlm_loss, nce_loss


# ----------------------------------------------------------------------------- main
if __name__ == "__main__":
    # Small shapes, chosen so row padding (R=18 -> 32) and vocab padding
    # (V=250 -> 256) are both exercised, with a real 2x2 (row, vocab) grid.
    B, S, H, V, NVEC = 2, 9, 32, 250, 2
    MOCO_T = 0.07
    LM_TM, LM_TN = 16, 128

    key = jax.random.PRNGKey(0)
    kp, k1, k2, k3, k4 = jax.random.split(key, 5)
    params = init_params(kp, H, V, max_pos=64)

    inputs_m = jax.random.randint(k1, (B, S), 0, V, jnp.int32)
    inputs1 = jax.random.randint(k2, (B, S), 0, V, jnp.int32)
    inputs2 = jax.random.randint(k3, (B, S), 0, V, jnp.int32)
    # MLM labels: ~half masked positions carry a target, rest are ignore_index.
    rand_tok = jax.random.randint(k4, (B, S), 0, V, jnp.int32)
    mask = (jnp.arange(B * S).reshape(B, S) % 2) == 0
    mlm_labels = jnp.where(mask, rand_tok, IGNORE_INDEX).astype(jnp.int32)

    # embedding-only branch (inputs1/inputs2 None)
    emb = simple_model_forward(params, inputs_m, n_vec=NVEC, moco_t=MOCO_T)

    # full branch: (lm_logits, mlm_loss, nce_loss)
    lm_logits, mlm_loss, nce_loss = simple_model_forward(
        params, inputs_m, inputs1, inputs2, mlm_labels=mlm_labels,
        n_vec=NVEC, moco_t=MOCO_T, lm_tm=LM_TM, lm_tn=LM_TN)

    jax.block_until_ready((emb, lm_logits, mlm_loss, nce_loss))

    assert emb.shape == (B, NVEC, H)
    assert lm_logits.shape == (B, S, V)
    assert mlm_loss.shape == () and nce_loss.shape == ()
    assert bool(jnp.isfinite(mlm_loss)) and bool(jnp.isfinite(nce_loss))

    # ---- pure-JAX reference checks (same bf16 matmul paths as the kernels) ----
    feat2d = encoder_stub(inputs_m, params["word_emb"], params["pos_emb"]).reshape(B * S, H)
    x = jnp.dot(feat2d.astype(jnp.bfloat16), params["w_dense_t_bf16"],
                preferred_element_type=jnp.float32) + params["b_dense"]
    g = _gelu(x)
    mu = g.mean(-1, keepdims=True)
    var = ((g - mu) ** 2).mean(-1, keepdims=True)
    y = (g - mu) * jax.lax.rsqrt(var + LN_EPS) * params["ln_gamma"] + params["ln_beta"]
    dec_w = params["dec_t_bf16"][:, :V]
    dec_b = params["dec_bias"][:, :V]
    ref_logits = jnp.dot(y.astype(jnp.bfloat16), dec_w,
                         preferred_element_type=jnp.float32) + dec_b
    lab = mlm_labels.reshape(-1)
    mm = ref_logits.max(-1, keepdims=True)
    lse = (mm + jnp.log(jnp.exp(ref_logits - mm).sum(-1, keepdims=True)))[:, 0]
    picked = jnp.take_along_axis(ref_logits, jnp.clip(lab, 0, V - 1)[:, None], axis=1)[:, 0]
    valid = lab != IGNORE_INDEX
    ref_mlm = jnp.where(valid, lse - picked, 0.0).sum() / valid.sum().astype(jnp.float32)
    assert bool(jnp.allclose(lm_logits.reshape(B * S, V).astype(jnp.float32),
                             ref_logits, atol=2e-2, rtol=2e-2))
    assert bool(jnp.allclose(mlm_loss, ref_mlm, atol=2e-3, rtol=2e-3))

    # embedding branch reference (F.normalize)
    sl = encoder_stub(inputs_m, params["word_emb"], params["pos_emb"])[:, :NVEC, :]
    ref_emb = sl * jax.lax.rsqrt(jnp.maximum(jnp.sum(sl * sl, -1, keepdims=True),
                                             NORM_EPS * NORM_EPS))
    assert bool(jnp.allclose(emb, ref_emb, atol=1e-5, rtol=1e-5))

    # NCE reference (bf16-quantized operands, f32 accumulation, like the kernel)
    o1 = encoder_stub(inputs1, params["word_emb"], params["pos_emb"])[:, 0, :]
    o2 = encoder_stub(inputs2, params["word_emb"], params["pos_emb"])[:, :NVEC, :]
    o1n = o1 * jax.lax.rsqrt(jnp.maximum(jnp.sum(o1 * o1, -1, keepdims=True),
                                         NORM_EPS * NORM_EPS))
    o2n = o2 * jax.lax.rsqrt(jnp.maximum(jnp.sum(o2 * o2, -1, keepdims=True),
                                         NORM_EPS * NORM_EPS))
    o1b = o1n.astype(jnp.bfloat16).astype(jnp.float32)
    o2b = o2n.astype(jnp.bfloat16).astype(jnp.float32)
    sim = jnp.einsum("nc,mvc->nmv", o1b, o2b,
                     precision=jax.lax.Precision.HIGHEST).max(-1) / MOCO_T
    mm2 = sim.max(-1, keepdims=True)
    lse2 = (mm2 + jnp.log(jnp.exp(sim - mm2).sum(-1, keepdims=True)))[:, 0]
    ref_nce = (lse2 - jnp.diagonal(sim)).mean()
    assert bool(jnp.allclose(nce_loss, ref_nce, atol=5e-3, rtol=5e-3))

    print("KERNEL_OK")
</pallas_src>

<mosaic_0001>
module attributes {stable_mosaic.version = 11 : i64} {
  func.func @_l2norm_kernel(%arg0: i32, %arg1: memref<8x32xf32, #tpu.memory_space<vmem>>, %arg2: memref<8x32xf32, #tpu.memory_space<vmem>>) attributes {dimension_semantics = [#tpu.dimension_semantics<parallel>], iteration_bounds = array<i64: 1>, scalar_prefetch = 0 : i64, scratch_operands = 0 : i64, tpu.core_type = #tpu.core_type<tc>, window_params = [{transform_indices = @transform_0, window_bounds = array<i64: 8, 32>}, {transform_indices = @transform_1, window_bounds = array<i64: 8, 32>}]} {
    %c0 = arith.constant 0 : index
    %c0_0 = arith.constant 0 : index
    %0 = vector.load %arg1[%c0, %c0_0] : memref<8x32xf32, #tpu.memory_space<vmem>>, vector<8x32xf32>
    %1 = arith.mulf %0, %0 : vector<8x32xf32>
    %cst = arith.constant dense<0.000000e+00> : vector<8xf32>
    %2 = vector.multi_reduction <add>, %1, %cst [1] : vector<8x32xf32> to vector<8xf32>
    %3 = vector.shape_cast %2 : vector<8xf32> to vector<8x1xf32>
    %cst_1 = arith.constant 1.000000e-24 : f32
    %4 = vector.broadcast %cst_1 : f32 to vector<8x1xf32>
    %5 = arith.maximumf %3, %4 : vector<8x1xf32>
    %6 = math.rsqrt %5 : vector<8x1xf32>
    %7 = vector.broadcast %6 : vector<8x1xf32> to vector<8x32xf32>
    %8 = arith.mulf %0, %7 : vector<8x32xf32>
    %c0_2 = arith.constant 0 : index
    %c0_3 = arith.constant 0 : index
    %9 = vector.load %arg2[%c0_2, %c0_3] : memref<8x32xf32, #tpu.memory_space<vmem>>, vector<8x32xf32>
    tpu.vector_store %arg2[%c0_2, %c0_3], %8 {strides = array<i32>} : memref<8x32xf32, #tpu.memory_space<vmem>>, vector<8x32xf32>,
    return
  }
  func.func @transform_0(%arg0: i32) -> (i32, i32) {
    %c0_i32 = arith.constant 0 : i32
    %c0_i32_0 = arith.constant 0 : i32
    return %arg0, %c0_i32 : i32, i32
  }
  func.func @transform_1(%arg0: i32) -> (i32, i32) {
    %c0_i32 = arith.constant 0 : i32
    %c0_i32_0 = arith.constant 0 : i32
    return %arg0, %c0_i32 : i32, i32
  }
}

</mosaic_0001>

<bundles_post_ra>
// kernel: tpu_custom_call.1
= control target key start
LH: loop header
LB: loop body
LE: loop exit
PB: predicated region body
PF: predicated region fallthrough
CT: control target
= control target key end

     0   :  { %6 = vsyncpa [#allocation3], 0  ;;  %s112_s0 = inlined_call_operand.hbm [shape: f32[8,32], index: 0, kind: input, shape index: {}]   ;;  %s113_s1 = inlined_call_operand.hbm [shape: f32[8,32], index: 1, kind: output, shape index: {}]  }
   0x1   :  { %7 = vsyncpa [#allocation4], 0  ;;  %s94_s6 = smov [#allocation2]  }
   0x2   :  { %s14_s7 = sshll.u32 %s94_s6, 4  ;;  %s15_s7 = int_to_ptr.vmem [resolvable:$true] %s14_s7 }
   0x3   :  { %s58_s8 = scalar_lea.vmem %s15_s7, 128  ;;  %p63_p1 = scmp.lt.s32.totalorder %s15_s7, %s15_s7 }
   0x4   :  { %p59_p0 = scmp.ne.s32.totalorder %s15_s7, %s58_s8  ;;  %p64_p2 = scmp.lt.s32.totalorder %s58_s8, %s58_s8 }
   0x6   :  { %p65_p3 = por %p64_p2, %p63_p1 }
   0x8   :  { %p66_p4 = pnand %p65_p3, %p59_p0 }
   0xa   :  { %69 = shalt.err (!%p66_p4)
}
   0xb   :  { %17 = dma.hbm_to_vmem [thread:$0]  %s112_s0, 128, %s15_s7, [#allocation3]  }
   0xc   :  { %90 = dma.done.wait [#allocation3], 128  }
   0xd   :  { %91 = vsyncadd [#allocation3], 4294967168  ;;  %v21_v0 = vld [vmem:[#allocation2] sm:$0xff]  ;;  %vm23_vm0 = vcmask 261120   ;;  %s95_s11 = smov [#allocation5]  }
   0xe   :  { %v22_v1 = vmul.f32 %v21_v0, %v21_v0  ;;  %s37_s12 = sshll.u32 %s95_s11, 4  ;;  %s38_s12 = int_to_ptr.vmem [resolvable:$true] %s37_s12 }
   0xf   :  { %s70_s13 = scalar_lea.vmem %s38_s12, 128  ;;  %p75_p6 = scmp.lt.s32.totalorder %s38_s12, %s38_s12 }
  0x10   :  { %v24_v2 = vsel %vm23_vm0, %v22_v1, 0.0  ;;  %p71_p5 = scmp.ne.s32.totalorder %s38_s12, %s70_s13  ;;  %p76_p7 = scmp.lt.s32.totalorder %s70_s13, %s70_s13 }
  0x11   :  { %25 = vadd.xlane.f32.xlu0 %v24_v2 }
  0x12   :  { %p77_p8 = por %p76_p7, %p75_p6 }
  0x14   :  { %p78_p9 = pnand %p77_p8, %p71_p5 }
  0x9a   :  { %v26_v3 = vpop.xlane.xlu0 %25 }
  0x9b   :  { %v27_v4 = vmax.f32 %v26_v3, 1e-24 }
  0x9d   :  { %48 = vrsqrt.f32 %v27_v4 }
  0xaa   :  { %v49_v5 = vpop.eup %48 }
  0xab   :  { %v29_v6 = vmul.f32 %v49_v5, %v21_v0 }
  0xad   :  { %30 = vst.msk [vmem:[#allocation5] sm:$0xff] %vm23_vm0, %v29_v6 }
  0xae   :  { %81 = shalt.err (!%p78_p9)
}
  0xaf   :  { %40 = dma.vmem_to_hbm [thread:$0]  %s38_s12, 128, %s113_s1, [#allocation4]  }
  0xb0   :  { %92 = dma.done.wait [#allocation4], 128  }
  0xb1   :  { %93 = vsyncadd [#allocation4], 4294967168 }
  0xb2   :  { %44 = vsyncpa [#allocation3], 1 }
  0xb3   :  { %45 = vsyncpa [#allocation4], 1 }

</bundles_post_ra>
